<compile_context>
chip_gen: v5e
topology: v5e:2x2
jax: 0.10.0
libtpu: 0.0.40
codegen_flags: <defaults>
</compile_context>

<pallas_src>
import jax
import jax.numpy as jnp
from jax.experimental import pallas as pl
from jax.experimental.pallas import tpu as pltpu

# ------------------------- static model configuration ------------------------
BATCH = 16
INPUT_DIM = 40                   # FeatureTransformer input_dim
OUTPUT_DIM = 32                  # FeatureTransformer output_dim
NUM_HEADS = 4
HEAD_SIZE = OUTPUT_DIM // NUM_HEADS
BN_EPS = 1e-5
MAX_BLOCK_B = 512                # upper bound on batch tile (multiple of 8)
# rows of the packed f32 vector slab (width 2*OUTPUT_DIM, unused lanes zero):
#   0 b1_fused(2F), 1 b2_fused_folded(2F), 2 bh_folded(F), 3 bn2_scale(F), 4 bn2_shift(F)
VEC_ROWS = 5


# --------------------------------- kernel ------------------------------------
def _sigmoid(x):
    # exp lands on the EUP; approximate reciprocal also lands on the EUP slot,
    # so the gate costs almost no VPU work.
    return pl.reciprocal(1.0 + jnp.exp(-x), approx=True)


def ft_kernel(x_ref, w1_ref, wh_ref, w2_ref, v_ref, o_ref):
    F = OUTPUT_DIM
    x = x_ref[...].astype(jnp.bfloat16)                 # [BB, D] bf16 matmul operand
    v = v_ref[...]                                      # [VEC_ROWS, 2F] f32
    b1 = v[0:1, :]                                      # [1, 2F]
    b2 = v[1:2, :]                                      # [1, 2F]  (BN_attn folded in)
    bh = v[2:3, :F]                                     # [1, F]   (BN1 folded in)
    s2 = v[3:4, :F]                                     # BN2 affine
    t2 = v[4:5, :F]

    # GLU1: one fused (lin|gate) matmul.  BN1 is folded downstream, so no affine.
    y1 = jnp.dot(x, w1_ref[...], preferred_element_type=jnp.float32) + b1   # [BB, 2F]
    h1 = y1[:, :F] * _sigmoid(y1[:, F:])                                    # [BB, F]

    # Multi-head Linear + Tanh: each head sees the full F-dim hidden vector, so
    # concat(head outputs) == one dense [F, F] matmul with weights stacked along
    # the output axis.  wh/bh already contain the folded BN1 affine.
    y2 = jnp.dot(h1.astype(jnp.bfloat16), wh_ref[...],
                 preferred_element_type=jnp.float32) + bh                   # [BB, F]
    h2 = jnp.tanh(y2)

    # GLU2: fused (lin|gate) matmul.  w2/b2 already contain the folded BN_attn.
    y3 = jnp.dot(h2.astype(jnp.bfloat16), w2_ref[...],
                 preferred_element_type=jnp.float32) + b2                   # [BB, 2F]
    h3 = y3[:, :F] * _sigmoid(y3[:, F:])                                    # [BB, F]

    # BN2 (eval stats folded to affine); Dropout is identity at inference.
    o_ref[...] = h3 * s2 + t2


# --------------------------------- wrapper -----------------------------------
def _round_up(n, m):
    return ((n + m - 1) // m) * m


@jax.jit
def feature_transformer_forward(x, w1_slab, wh_slab, w2_slab, v_slab):
    b = x.shape[0]
    # Largest batch tile that (a) stays far inside VMEM and (b) keeps >= 2 grid
    # steps whenever possible so "parallel" semantics can use both v7x cores.
    block_b = max(8, min(MAX_BLOCK_B, _round_up(-(-b // 2), 8)))
    padded_b = _round_up(b, block_b)
    if padded_b != b:                      # handle batch remainders by padding
        x = jnp.pad(x, ((0, padded_b - b), (0, 0)))
    grid = (padded_b // block_b,)

    out = pl.pallas_call(
        ft_kernel,
        out_shape=jax.ShapeDtypeStruct((padded_b, OUTPUT_DIM), jnp.float32),
        grid=grid,
        in_specs=[
            pl.BlockSpec((block_b, INPUT_DIM), lambda i: (i, 0)),
            pl.BlockSpec((INPUT_DIM, 2 * OUTPUT_DIM), lambda i: (0, 0)),
            pl.BlockSpec((OUTPUT_DIM, OUTPUT_DIM), lambda i: (0, 0)),
            pl.BlockSpec((OUTPUT_DIM, 2 * OUTPUT_DIM), lambda i: (0, 0)),
            pl.BlockSpec((VEC_ROWS, 2 * OUTPUT_DIM), lambda i: (0, 0)),
        ],
        out_specs=pl.BlockSpec((block_b, OUTPUT_DIM), lambda i: (i, 0)),
        compiler_params=pltpu.CompilerParams(dimension_semantics=("parallel",)),
    )(x, w1_slab, wh_slab, w2_slab, v_slab)
    return out[:b]


# ------------------------------ parameter setup -------------------------------
def _nrm(key, shape, scale=0.1):
    return scale * jax.random.normal(key, shape, jnp.float32)


def make_raw_params(key):
    """Raw parameters mirroring the PyTorch module (weights pre-transposed [in, out])."""
    D, F = INPUT_DIM, OUTPUT_DIM
    ks = jax.random.split(key, 9)

    def bn_stats(k):
        k1, k2, k3, k4 = jax.random.split(k, 4)
        gamma = 1.0 + 0.1 * jax.random.normal(k1, (F,), jnp.float32)
        beta = 0.1 * jax.random.normal(k2, (F,), jnp.float32)
        mean = 0.1 * jax.random.normal(k3, (F,), jnp.float32)
        var = jax.random.uniform(k4, (F,), jnp.float32, minval=0.5, maxval=1.5)
        return gamma, beta, mean, var

    return dict(
        w1=_nrm(ks[0], (D, 2 * F)), b1=_nrm(ks[1], (2 * F,)),       # GLU1 Linear(D, 2F)
        bn1=bn_stats(ks[2]),
        wh=_nrm(ks[3], (F, F)), bh=_nrm(ks[4], (F,)),               # heads stacked along out
        bna=bn_stats(ks[5]),
        w2=_nrm(ks[6], (F, 2 * F)), b2=_nrm(ks[7], (2 * F,)),       # GLU2 Linear(F, 2F)
        bn2=bn_stats(ks[8]),
    )


def pack_params(raw):
    """One-time transform: fold BN1/BN_attn into downstream weights, BN2 to affine,
    cast matmul weights to bf16, pack biases/affines into one f32 slab."""
    F = OUTPUT_DIM

    def fold(bn):
        g, b, m, v = bn
        scale = g / jnp.sqrt(v + BN_EPS)
        shift = b - m * scale
        return scale, shift

    s1, t1 = fold(raw["bn1"])
    sa, ta = fold(raw["bna"])
    s2, t2 = fold(raw["bn2"])

    # GLU1 fused weight/bias (lin | gate columns)
    w1 = raw["w1"]
    b1 = raw["b1"]

    # BN1 folded into the stacked head weights:  (h*s1 + t1) @ Wh + bh
    wh = s1[:, None] * raw["wh"]
    bh = t1 @ raw["wh"] + raw["bh"]

    # BN_attn folded into the fused GLU2 weights: (h*sa + ta) @ W2 + b2
    w2 = sa[:, None] * raw["w2"]
    b2 = ta @ raw["w2"] + raw["b2"]

    v_slab = jnp.zeros((VEC_ROWS, 2 * F), jnp.float32)
    v_slab = v_slab.at[0].set(b1)
    v_slab = v_slab.at[1].set(b2)
    v_slab = v_slab.at[2, :F].set(bh)
    v_slab = v_slab.at[3, :F].set(s2)
    v_slab = v_slab.at[4, :F].set(t2)

    return (w1.astype(jnp.bfloat16),
            wh.astype(jnp.bfloat16),
            w2.astype(jnp.bfloat16),
            v_slab)


def reference_forward(x, raw):
    """Pure-JAX eval-mode reference (unfolded BN, f32), for a numerical check."""
    F = OUTPUT_DIM

    def bn(h, p):
        g, b, m, v = p
        return (h - m) / jnp.sqrt(v + BN_EPS) * g + b

    h = x @ raw["w1"] + raw["b1"]
    h = h[:, :F] * jax.nn.sigmoid(h[:, F:])
    h = bn(h, raw["bn1"])
    h = jnp.tanh(h @ raw["wh"] + raw["bh"])
    h = bn(h, raw["bna"])
    h = h @ raw["w2"] + raw["b2"]
    h = h[:, :F] * jax.nn.sigmoid(h[:, F:])
    h = bn(h, raw["bn2"])
    return h   # dropout = identity at inference


if __name__ == "__main__":
    key = jax.random.PRNGKey(0)
    k_x, k_p = jax.random.split(key)
    x = jax.random.normal(k_x, (BATCH, INPUT_DIM), jnp.float32)

    raw = make_raw_params(k_p)
    w1_slab, wh_slab, w2_slab, v_slab = pack_params(raw)

    out = feature_transformer_forward(x, w1_slab, wh_slab, w2_slab, v_slab)
    out = jax.block_until_ready(out)

    assert out.shape == (BATCH, OUTPUT_DIM), out.shape
    assert bool(jnp.all(jnp.isfinite(out))), "non-finite output"
    ref = reference_forward(x, raw)
    assert bool(jnp.allclose(out, ref, atol=2e-2, rtol=2e-2)), "mismatch vs reference"
    print("KERNEL_OK")
</pallas_src>

<mosaic_0001>
module attributes {stable_mosaic.version = 11 : i64} {
  func.func @ft_kernel(%arg0: i32, %arg1: memref<8x40xf32, #tpu.memory_space<vmem>>, %arg2: memref<40x64xbf16, #tpu.memory_space<vmem>>, %arg3: memref<32x32xbf16, #tpu.memory_space<vmem>>, %arg4: memref<32x64xbf16, #tpu.memory_space<vmem>>, %arg5: memref<5x64xf32, #tpu.memory_space<vmem>>, %arg6: memref<8x32xf32, #tpu.memory_space<vmem>>) attributes {dimension_semantics = [#tpu.dimension_semantics<parallel>], iteration_bounds = array<i64: 2>, scalar_prefetch = 0 : i64, scratch_operands = 0 : i64, tpu.core_type = #tpu.core_type<tc>, window_params = [{transform_indices = @transform_0, window_bounds = array<i64: 8, 40>}, {pipeline_mode = #tpu.pipeline_mode<synchronous>, transform_indices = @transform_1, window_bounds = array<i64: 40, 64>}, {pipeline_mode = #tpu.pipeline_mode<synchronous>, transform_indices = @transform_2, window_bounds = array<i64: 32, 32>}, {pipeline_mode = #tpu.pipeline_mode<synchronous>, transform_indices = @transform_3, window_bounds = array<i64: 32, 64>}, {pipeline_mode = #tpu.pipeline_mode<synchronous>, transform_indices = @transform_4, window_bounds = array<i64: 5, 64>}, {transform_indices = @transform_5, window_bounds = array<i64: 8, 32>}]} {
    %c0 = arith.constant 0 : index
    %c0_0 = arith.constant 0 : index
    %0 = vector.load %arg1[%c0, %c0_0] : memref<8x40xf32, #tpu.memory_space<vmem>>, vector<8x40xf32>
    %1 = arith.truncf %0 : vector<8x40xf32> to vector<8x40xbf16>
    %c0_1 = arith.constant 0 : index
    %c0_2 = arith.constant 0 : index
    %2 = vector.load %arg5[%c0_1, %c0_2] : memref<5x64xf32, #tpu.memory_space<vmem>>, vector<5x64xf32>
    %3 = vector.extract_strided_slice %2 {offsets = [0, 0], sizes = [1, 64], strides = [1, 1]} : vector<5x64xf32> to vector<1x64xf32>
    %4 = vector.extract_strided_slice %2 {offsets = [1, 0], sizes = [1, 64], strides = [1, 1]} : vector<5x64xf32> to vector<1x64xf32>
    %5 = vector.extract_strided_slice %2 {offsets = [2, 0], sizes = [1, 32], strides = [1, 1]} : vector<5x64xf32> to vector<1x32xf32>
    %6 = vector.extract_strided_slice %2 {offsets = [3, 0], sizes = [1, 32], strides = [1, 1]} : vector<5x64xf32> to vector<1x32xf32>
    %7 = vector.extract_strided_slice %2 {offsets = [4, 0], sizes = [1, 32], strides = [1, 1]} : vector<5x64xf32> to vector<1x32xf32>
    %c0_3 = arith.constant 0 : index
    %c0_4 = arith.constant 0 : index
    %8 = vector.load %arg2[%c0_3, %c0_4] : memref<40x64xbf16, #tpu.memory_space<vmem>>, vector<40x64xbf16>
    %cst = arith.constant dense<0.000000e+00> : vector<8x64xf32>
    %9 = tpu.matmul %1, %8, %cst {dimension_numbers = #tpu.dot_dimension_numbers<[1], [0], [0], [1], [0, 0, 1, 1], [], []>} : vector<8x40xbf16>, vector<40x64xbf16>, vector<8x64xf32> -> vector<8x64xf32>
    %10 = vector.broadcast %3 : vector<1x64xf32> to vector<8x64xf32>
    %11 = arith.addf %9, %10 : vector<8x64xf32>
    %12 = vector.extract_strided_slice %11 {offsets = [0, 0], sizes = [8, 32], strides = [1, 1]} : vector<8x64xf32> to vector<8x32xf32>
    %13 = vector.extract_strided_slice %11 {offsets = [0, 32], sizes = [8, 32], strides = [1, 1]} : vector<8x64xf32> to vector<8x32xf32>
    %cst_5 = arith.constant 0.000000e+00 : f32
    %14 = vector.broadcast %cst_5 : f32 to vector<8x32xf32>
    %15 = arith.subf %14, %13 : vector<8x32xf32>
    %16 = math.exp %15 : vector<8x32xf32>
    %cst_6 = arith.constant 1.000000e+00 : f32
    %17 = vector.broadcast %cst_6 : f32 to vector<8x32xf32>
    %18 = arith.addf %17, %16 : vector<8x32xf32>
    %19 = tpu.reciprocal %18 {approx = true} : vector<8x32xf32> -> vector<8x32xf32>
    %20 = arith.mulf %12, %19 : vector<8x32xf32>
    %21 = arith.truncf %20 : vector<8x32xf32> to vector<8x32xbf16>
    %c0_7 = arith.constant 0 : index
    %c0_8 = arith.constant 0 : index
    %22 = vector.load %arg3[%c0_7, %c0_8] : memref<32x32xbf16, #tpu.memory_space<vmem>>, vector<32x32xbf16>
    %cst_9 = arith.constant dense<0.000000e+00> : vector<8x32xf32>
    %23 = tpu.matmul %21, %22, %cst_9 {dimension_numbers = #tpu.dot_dimension_numbers<[1], [0], [0], [1], [0, 0, 1, 1], [], []>} : vector<8x32xbf16>, vector<32x32xbf16>, vector<8x32xf32> -> vector<8x32xf32>
    %24 = vector.broadcast %5 : vector<1x32xf32> to vector<8x32xf32>
    %25 = arith.addf %23, %24 : vector<8x32xf32>
    %26 = math.tanh %25 : vector<8x32xf32>
    %27 = arith.truncf %26 : vector<8x32xf32> to vector<8x32xbf16>
    %c0_10 = arith.constant 0 : index
    %c0_11 = arith.constant 0 : index
    %28 = vector.load %arg4[%c0_10, %c0_11] : memref<32x64xbf16, #tpu.memory_space<vmem>>, vector<32x64xbf16>
    %cst_12 = arith.constant dense<0.000000e+00> : vector<8x64xf32>
    %29 = tpu.matmul %27, %28, %cst_12 {dimension_numbers = #tpu.dot_dimension_numbers<[1], [0], [0], [1], [0, 0, 1, 1], [], []>} : vector<8x32xbf16>, vector<32x64xbf16>, vector<8x64xf32> -> vector<8x64xf32>
    %30 = vector.broadcast %4 : vector<1x64xf32> to vector<8x64xf32>
    %31 = arith.addf %29, %30 : vector<8x64xf32>
    %32 = vector.extract_strided_slice %31 {offsets = [0, 0], sizes = [8, 32], strides = [1, 1]} : vector<8x64xf32> to vector<8x32xf32>
    %33 = vector.extract_strided_slice %31 {offsets = [0, 32], sizes = [8, 32], strides = [1, 1]} : vector<8x64xf32> to vector<8x32xf32>
    %cst_13 = arith.constant 0.000000e+00 : f32
    %34 = vector.broadcast %cst_13 : f32 to vector<8x32xf32>
    %35 = arith.subf %34, %33 : vector<8x32xf32>
    %36 = math.exp %35 : vector<8x32xf32>
    %cst_14 = arith.constant 1.000000e+00 : f32
    %37 = vector.broadcast %cst_14 : f32 to vector<8x32xf32>
    %38 = arith.addf %37, %36 : vector<8x32xf32>
    %39 = tpu.reciprocal %38 {approx = true} : vector<8x32xf32> -> vector<8x32xf32>
    %40 = arith.mulf %32, %39 : vector<8x32xf32>
    %41 = vector.broadcast %6 : vector<1x32xf32> to vector<8x32xf32>
    %42 = arith.mulf %40, %41 : vector<8x32xf32>
    %43 = vector.broadcast %7 : vector<1x32xf32> to vector<8x32xf32>
    %44 = arith.addf %42, %43 : vector<8x32xf32>
    %c0_15 = arith.constant 0 : index
    %c0_16 = arith.constant 0 : index
    %45 = vector.load %arg6[%c0_15, %c0_16] : memref<8x32xf32, #tpu.memory_space<vmem>>, vector<8x32xf32>
    tpu.vector_store %arg6[%c0_15, %c0_16], %44 {strides = array<i32>} : memref<8x32xf32, #tpu.memory_space<vmem>>, vector<8x32xf32>,
    return
  }
  func.func @transform_0(%arg0: i32) -> (i32, i32) {
    %c0_i32 = arith.constant 0 : i32
    %c0_i32_0 = arith.constant 0 : i32
    return %arg0, %c0_i32 : i32, i32
  }
  func.func @transform_1(%arg0: i32) -> (i32, i32) {
    %c0_i32 = arith.constant 0 : i32
    %c0_i32_0 = arith.constant 0 : i32
    %c0_i32_1 = arith.constant 0 : i32
    return %c0_i32, %c0_i32_0 : i32, i32
  }
  func.func @transform_2(%arg0: i32) -> (i32, i32) {
    %c0_i32 = arith.constant 0 : i32
    %c0_i32_0 = arith.constant 0 : i32
    %c0_i32_1 = arith.constant 0 : i32
    return %c0_i32, %c0_i32_0 : i32, i32
  }
  func.func @transform_3(%arg0: i32) -> (i32, i32) {
    %c0_i32 = arith.constant 0 : i32
    %c0_i32_0 = arith.constant 0 : i32
    %c0_i32_1 = arith.constant 0 : i32
    return %c0_i32, %c0_i32_0 : i32, i32
  }
  func.func @transform_4(%arg0: i32) -> (i32, i32) {
    %c0_i32 = arith.constant 0 : i32
    %c0_i32_0 = arith.constant 0 : i32
    %c0_i32_1 = arith.constant 0 : i32
    return %c0_i32, %c0_i32_0 : i32, i32
  }
  func.func @transform_5(%arg0: i32) -> (i32, i32) {
    %c0_i32 = arith.constant 0 : i32
    %c0_i32_0 = arith.constant 0 : i32
    return %arg0, %c0_i32 : i32, i32
  }
}

</mosaic_0001>

<bundles_post_ra>
// kernel: feature_transformer_forward.1
= control target key start
LH: loop header
LB: loop body
LE: loop exit
PB: predicated region body
PF: predicated region fallthrough
CT: control target
= control target key end

     0   :  { %10 = vsyncpa [#allocation3], 0  ;;  %s1163_s0 = inlined_call_operand.hbm [shape: f32[16,40], index: 0, kind: input, shape index: {}]   ;;  %s1164_s1 = inlined_call_operand.hbm [shape: bf16[40,64], index: 1, kind: input, shape index: {}]   ;;  %s1165_s2 = inlined_call_operand.hbm [shape: bf16[32,32], index: 2, kind: input, shape index: {}]   ;;  %s1166_s3 = inlined_call_operand.hbm [shape: bf16[32,64], index: 3, kind: input, shape index: {}]   ;;  %s1167_s4 = inlined_call_operand.hbm [shape: f32[5,64], index: 4, kind: input, shape index: {}]   ;;  %s1168_s5 = inlined_call_operand.hbm [shape: f32[16,32], index: 5, kind: output, shape index: {}]  }
   0x1   :  { %12 = vsyncpa [#allocation3 + $0x1], 0 }
   0x2   :  { %13 = vsyncpa [#allocation6], 0 }
   0x3   :  { %14 = vsyncpa [#allocation9], 0 }
   0x4   :  { %15 = vsyncpa [#allocation4], 0 }
   0x5   :  { %17 = vsyncpa [#allocation4 + $0x1], 0  ;;  %s987_s18 = smov 0   ;;  %s989_s19 = smov 0  }
   0x6   :  { %s991_s20 = smov 0   ;;  %s993_s21 = smov 0  }
   0x7 LB: > { %s175_s24 = sshll.u32 %s1164_s1, 4  ;;  %s1011_s25 = sadd.s32 4294967295, %s948_s21   ;;  %s948_s21 = sphi %s993_s21, %s1180_s21   ;;  %s944_s20 = sphi %s991_s20, %s1179_s20   ;;  %s940_s19 = sphi %s989_s19, %s1178_s19   ;;  %s936_s18 = sphi %s987_s18, %s1177_s18   ;;  %s176_s24 = int_to_ptr.hbm [resolvable:$true] %s175_s24 }
   0x8   : > { %p572_p0 = scmp.ge.s32.totalorder %s948_s21, 1  ;;  %p44_p1 = scmp.eq.s32.totalorder %s1011_s25, 0 }
   0x9   : > { %p164_p2 = scmp.lt.s32.totalorder %s948_s21, 3  ;;  %s950_s27 = smov [#allocation5]  }
   0xa   : > { %s177_s28 = sshll.u32 %s950_s27, 4  ;;  %s203_s6 = sshll.u32 %s1166_s3, 4  ;;  %s178_s28 = int_to_ptr.vmem [resolvable:$true] %s177_s28  ;;  %s204_s6 = int_to_ptr.hbm [resolvable:$true] %s203_s6 }
   0xb   : > { %p1016_p3 = pnand %p572_p0, %p164_p2  ;;  %s189_s10 = sshll.u32 %s1165_s2, 4  ;;  %s190_s10 = int_to_ptr.hbm [resolvable:$true] %s189_s10 }
   0xc   : > { %s951_s11 = smov [#allocation8]   ;;  %s952_s13 = smov 64  }
   0xd   : > { %p644_p4 = pneg %p1016_p3  ;;  %s205_s12 = sshll.u32 %s951_s11, 4  ;;  %s206_s12 = int_to_ptr.vmem [resolvable:$true] %s205_s12 }
   0xe   : > { %s953_s14 = smov 4   ;;  %s218_s17 = sshll.u32 %s1167_s4, 4  ;;  %s219_s17 = int_to_ptr.hbm [resolvable:$true] %s218_s17 }
   0xf   : > { %p1028_p6 = pnand %p644_p4, %p44_p1  ;;  %s954_s22 = smov [#allocation7]  }
  0x10   : > { %s191_s23 = sshll.u32 %s954_s22, 4  ;;  %s1048_s29 = sadd.s32 1, %s948_s21   ;;  %s192_s23 = int_to_ptr.vmem [resolvable:$true] %s191_s23 }
  0x11   : > { %647 = dma.hbm_to_vmem [thread:$0]  (!%p1028_p6), %s176_s24, 320, %s178_s28, [#allocation6], %s952_s13, %s952_s13, %s953_s14  }
  0x12   : > { %653 = dma.hbm_to_vmem [thread:$0]  (!%p1028_p6), %s204_s6, 256, %s206_s12, [#allocation9], %s952_s13, %s952_s13, %s953_s14  }
  0x13   : > { %650 = dma.hbm_to_vmem [thread:$0]  (!%p1028_p6), %s190_s10, 256, %s192_s23, [#allocation6], %s952_s13, %s952_s13, %s953_s14  }
  0x14   : > { %s955_s24 = smov [#allocation10]   ;;  %s571_s28 = sadd.s32 4294967294, %s948_s21  }
  0x15   : > { %s220_s27 = sshll.u32 %s955_s24, 4  ;;  %s27_s30 = ssub.s32 %s948_s21, %s1048_s29  ;;  %s221_s27 = int_to_ptr.vmem [resolvable:$true] %s220_s27 }
  0x16   : > { %656 = dma.hbm_to_vmem [thread:$0]  (!%p1028_p6), %s219_s17, 128, %s221_s27, [#allocation9]  }
  0x17   : > { %s30_s6 = sadd.s32 1, %s944_s20  ;;  %p28_p7 = scmp.eq.s32.totalorder %s27_s30, 0 }
  0x18   : > { %p37_p8 = scmp.ne.s32.totalorder %s944_s20, %s940_s19  ;;  %p38_p9 = scmp.eq.s32.totalorder %s948_s21, 0 }
  0x19   : > { %p43_p10 = scmp.ne.s32.totalorder %s940_s19, %s936_s18  ;;  %p151_p13 = scmp.eq.s32.totalorder %s1011_s25, 1 }
  0x1a   : > { %s1059_s8 = scalar_select %p28_p7, %s944_s20, %s30_s6  }
  0x1b   : > { %p1061_p11 = por %p38_p9, %p37_p8  ;;  %p1067_p12 = por %p44_p1, %p43_p10 }
  0x1c   : > { %p157_p0 = scmp.eq.s32.totalorder %s571_s28, 1  ;;  %p669_p2 = scmp.lt.s32.totalorder %s948_s21, 2 }
  0x1d   : > { %s231_s10 = sand.u32 1, %s944_s20   ;;  %p1074_p4 = por %p151_p13, %p37_p8 }
  0x1e   : > { %p1078_p6 = por %p157_p0, %p43_p10  ;;  %s578_s13 = sshll.u32 %s231_s10, 3 }
  0x1f   : > { %s579_s14 = sshll.u32 %s948_s21, 3  ;;  %s235_s22 = scalar_lea.vmem [#allocation2], %s578_s13 }
  0x20   : > { %s239_s17 = scalar_lea.hbm %s1163_s0, %s579_s14  ;;  %s243_s23 = sshll.u32 %s235_s22, 4  ;;  %s244_s23 = int_to_ptr.vmem [resolvable:$true] %s243_s23 }
  0x21   : > { %s241_s24 = sshll.u32 %s239_s17, 4  ;;  %p1088_p7 = pnand %p669_p2, %p1061_p11  ;;  %s242_s24 = int_to_ptr.hbm [resolvable:$true] %s241_s24 }
  0x22   : > { %s232_s28 = scalar_lea.sflag [#allocation3], %s231_s10  ;;  %s844_s30 = sshra.s32 %s242_s24, 4  ;;  %s845_s30 = int_to_ptr.hbm [resolvable:$true] %s844_s30 }
  0x23   : > { %s846_s6 = scalar_lea.hbm %s845_s30, 8  ;;  %p848_p9 = pneg %p1088_p7 }
  0x24   : > { %p847_p8 = scmp.ne.s32.totalorder %s845_s30, %s846_s6  ;;  %s851_s15 = scalar_lea.hbm %s1163_s0, 16 }
  0x25   : > { %p852_p11 = scmp.lt.s32.totalorder %s845_s30, %s1163_s0  ;;  %p853_p0 = scmp.lt.s32.totalorder %s851_s15, %s846_s6 }
  0x26   : > { %p849_p10 = pnand %p848_p9, %p847_p8 }
  0x27   : > { %p854_p2 = por %p853_p0, %p852_p11 }
  0x28   : > { %p850_p13 = pneg %p849_p10 }
  0x2a   : > { %p855_p5 = pnand %p854_p2, %p850_p13 }
  0x2c   : > { %858 = shalt.err (!%p855_p5)
}
  0x2d   : > { %660 = dma.hbm_to_vmem [thread:$0]  (!%p1088_p7), %s242_s24, 128, %s244_s23, %s232_s28  }
  0x2e   : > { %252 = sbr.rel (%p1016_p3) target bundleno = 755 (0x2f3), region = 40  ;;  %s1105_s10 = sand.u32 (!%p1016_p3), 1, %s940_s19  }
  0x2f   : > { %s581_s17 = sshll.u32 (!%p1016_p3), %s1105_s10, 3  ;;  %s255_s22 = scalar_lea.sflag (!%p1016_p3), [#allocation3], %s1105_s10 }
  0x30   : > { %s258_s30 = scalar_lea.vmem (!%p1016_p3), [#allocation2], %s581_s17 }
  0x33   : > { %919 = dma.done.wait (%p1067_p12), %s255_s22, 128  }
  0x34   : > { %921 = vsyncadd (%p1067_p12), %s255_s22, 4294967168 }
  0x35   : > { %923 = dma.done.wait (%p44_p1), [#allocation6], 576  }
  0x36   : > { %925 = vsyncadd (%p44_p1), [#allocation6], 4294966720 }
  0x37   : > { %927 = dma.done.wait (%p44_p1), [#allocation9], 384  }
  0x38   : > { %929 = vsyncadd (%p44_p1), [#allocation9], 4294966912  ;;  %v314_v0 = vld [vmem:[#allocation5 + $0x10] sm:$0xf]  ;;  %vm335_vm0 = vcmask 1043456   ;;  %v619_v4 = vld [vmem:[#allocation5 + $0x8] sm:$0xff] }
  0x39   : > { %v325_v1 = vunpack.c.l.b16 %v314_v0  ;;  %v618_v5 = vld [vmem:[#allocation5] sm:$0xff]  ;;  %v307_v6 = vld [vmem:[%s258_s30] sm:$0xff]  ;;  %vm331_vm1 = vcmask 326656   ;;  %s956_s26 = smov 96   ;;  %vm380_vm2 = vcmask 261120   ;;  %s615_s7 = sshll.u32 %s1011_s25, 3 }
  0x3a   : > { %v308_v7 = vpack.c.bf16 %v307_v6, %v307_v6  ;;  %v621_v8 = vld [vmem:[#allocation7 + $0x8] sm:$0xff]  ;;  %v309_v9 = vld [vmem:[#allocation10] sm:$0x1f]  ;;  %v623_v23 = vld [vmem:[#allocation8 + $0x8] sm:$0xff]  ;;  %s458_s27 = scalar_lea.hbm %s1168_s5, %s615_s7  ;;  %s305_s28 = scalar_lea.vmem [#allocation11], %s581_s17 }
  0x3b   : > { %v328_v2 = vpack.c.b16 %v325_v1, %v325_v1  ;;  %390 = vmatpush.bf16.msra.mxu1 %v621_v8  ;;  %v315_v10 = vperm.slane %v309_v9, 0  ;;  %v620_v19 = vld [vmem:[#allocation7] sm:$0xff]  ;;  %425 = vmatpush.bf16.msra.mxu2 %v623_v23  ;;  %v622_v24 = vld [vmem:[#allocation8] sm:$0xff]  ;;  %v367_v25 = vperm.slane %v309_v9, 2  ;;  %v403_v31 = vperm.slane %v309_v9, 1  ;;  %s460_s6 = sshll.u32 %s305_s28, 4  ;;  %s461_s6 = int_to_ptr.vmem [resolvable:$true] %s460_s6 }
  0x3c   : > { %v442_v40 = vperm.slane %v309_v9, 3  ;;  %v444_v42 = vperm.slane %v309_v9, 4  ;;  %s462_s13 = sshll.u32 %s458_s27, 4  ;;  %s448_s25 = scalar_lea.sflag [#allocation4], %s1105_s10  ;;  %s463_s13 = int_to_ptr.hbm [resolvable:$true] %s462_s13 }
  0x3d   : > { %v337_v3 = vsel %vm335_vm0, %v328_v2, 0  ;;  %s888_s14 = sshra.s32 %s463_s13, 4  ;;  %s894_s17 = scalar_lea.hbm %s1168_s5, 16  ;;  %s889_s14 = int_to_ptr.hbm [resolvable:$true] %s888_s14 }
  0x3e   : > { %344 = vmatpush.bf16.msra.mxu0 %v337_v3  ;;  %s890_s15 = scalar_lea.hbm %s889_s14, 8  ;;  %p895_p12 = scmp.lt.s32.totalorder %s889_s14, %s1168_s5 }
  0x3f   : > { %391 = vmatpush.bf16.msra.mxu1 %v620_v19  ;;  %426 = vmatpush.bf16.msra.mxu2 %v622_v24  ;;  %p891_p1 = scmp.ne.s32.totalorder %s889_s14, %s890_s15  ;;  %p896_p7 = scmp.lt.s32.totalorder %s894_s17, %s890_s15 }
  0x41   : > { %p892_p3 = pnand %p891_p1, %p1074_p4  ;;  %p897_p8 = por %p896_p7, %p895_p12 }
  0x42   : > { %345 = vmatpush.bf16.msra.mxu0 %v619_v4 }
  0x43   : > { %p893_p5 = pneg %p892_p3 }
  0x45   : > { %p898_p9 = pnand %p897_p8, %p893_p5 }
  0x46   : > { %346 = vmatpush.bf16.msra.mxu0 %v618_v5 }
  0x49   : > { %595 = vmatmul.msk.bf16.vlgmr.msra.gmra.mxu0 %vm331_vm1, %v308_v7 }
  0xc6   : > { %v348_v11 = vpop.f32.mrf.mxu0 }
  0xc7   : > { %v349_v12 = vadd.f32 %v348_v11, %v315_v10 }
  0xc9   : > { %v352_v13 = vsub.f32 0.0, %v349_v12 }
  0xcb   : > { %v353_v14 = vmul.f32 1.442695, %v352_v13 }
  0xcd   : > { %714 = vpow2.f32 %v353_v14 }
  0xce   : > { %v350_v15 = vpop.f32.mrf.mxu0 }
  0xd3   : > { %v715_v16 = vpop.eup %714 }
  0xd4   : > { %v355_v17 = vadd.f32 1.0, %v715_v16 }
  0xd6   : > { %716 = vrcp.f32 %v355_v17 }
  0xdc   : > { %v717_v18 = vpop.eup %716 }
  0xdd   : > { %358 = vrot.lane.b32.xlu0 %v717_v18, %s956_s26 }
 0x14f   : > { %v359_v20 = vpop.permute.xlu0 %358 }
 0x150   : > { %v361_v21 = vmul.f32 %v359_v20, %v349_v12 }
 0x152   : > { %v362_v22 = vpack.c.bf16 %v361_v21, %v361_v21 }
 0x154   : > { %604 = vmatmul.msk.bf16.vlgmr.msra.gmra.mxu1 %vm380_vm2, %v362_v22 }
 0x1d1   : > { %v393_v26 = vpop.f32.mrf.mxu1 }
 0x1d2   : > { %v394_v27 = vadd.f32 %v393_v26, %v367_v25 }
 0x1d4   : > { %718 = vtanh.f32 %v394_v27 }
 0x1d9   : > { %v395_v28 = vpop.f32.mrf.mxu1 }
 0x1da   : > { %v719_v29 = vpop.eup %718 }
 0x1db   : > { %v398_v30 = vpack.c.bf16 %v719_v29, %v719_v29 }
 0x1dd   : > { %613 = vmatmul.msk.bf16.vlgmr.msra.gmra.mxu2 %vm380_vm2, %v398_v30 }
 0x260   : > { %v428_v32 = vpop.f32.mrf.mxu2 }
 0x261   : > { %v429_v33 = vadd.f32 %v428_v32, %v403_v31 }
 0x263   : > { %v432_v34 = vsub.f32 0.0, %v429_v33 }
 0x265   : > { %v433_v35 = vmul.f32 1.442695, %v432_v34 }
 0x267   : > { %720 = vpow2.f32 %v433_v35 }
 0x268   : > { %v430_v36 = vpop.f32.mrf.mxu2 }
 0x26d   : > { %v721_v37 = vpop.eup %720 }
 0x26e   : > { %v435_v38 = vadd.f32 1.0, %v721_v37 }
 0x270   : > { %722 = vrcp.f32 %v435_v38 }
 0x276   : > { %v723_v39 = vpop.eup %722 }
 0x277   : > { %438 = vrot.lane.b32.xlu0 %v723_v39, %s956_s26 }
 0x2e9   : > { %v439_v41 = vpop.permute.xlu0 %438 }
 0x2ea   : > { %v441_v43 = vmul.f32 %v439_v41, %v429_v33 }
 0x2ec   : > { %v443_v44 = vmul.f32 %v442_v40, %v441_v43 }
 0x2ee   : > { %v445_v45 = vadd.f32 %v444_v42, %v443_v44 }
 0x2f0   : > { %446 = vst.msk [vmem:[%s305_s28] sm:$0xff] %vm380_vm2, %v445_v45 }
 0x2f1   : > { %901 = shalt.err (!%p898_p9)
}
 0x2f2   : > { %642 = dma.vmem_to_hbm [thread:$0]  (%p1074_p4), %s461_s6, 128, %s463_s13, %s448_s25  }
 0x2f3 PF: > { %s474_s10 = sand.u32 1, %s936_s18   ;;  %p1176_p10 = scmp.ge.s32.totalorder %s948_s21, 2 }
 0x2f4   : > { %s475_s26 = scalar_lea.sflag [#allocation4], %s474_s10 }
 0x2f5   : > { %p662_p13 = pnand %p1176_p10, %p1078_p6 }
 0x2f7   : > { %p663_p11 = pneg %p662_p13 }
 0x2f9   : > { %931 = dma.done.wait (%p663_p11), %s475_s26, 128  }
 0x2fa   : > { %933 = vsyncadd (%p663_p11), %s475_s26, 4294967168  ;;  %p20_p0 = scmp.ge.s32.totalorder %s1048_s29, 4   ;;  %s1177_s18 = smov %s940_s19 }
 0x2fb   : > { %s1178_s19 = smov %s944_s20  ;;  %s1179_s20 = smov %s1059_s8 }
 0x2fc   : > { %s1180_s21 = smov %s1048_s29  ;;  %22 = sbr.rel (!%p20_p0) target bundleno = 7 (0x7), region = 101 }
 0x301   :  { %481 = vsyncpa [#allocation3], 1 }
 0x302   :  { %483 = vsyncpa [#allocation3 + $0x1], 1 }
 0x303   :  { %484 = vsyncpa [#allocation6], 1 }
 0x304   :  { %485 = vsyncpa [#allocation9], 1 }
 0x305   :  { %486 = vsyncpa [#allocation4], 1 }
 0x306   :  { %488 = vsyncpa [#allocation4 + $0x1], 1 }

</bundles_post_ra>
